<compile_context>
chip_gen: v7x
topology: tpu7x:2x2x1
jax: 0.10.0
libtpu: 0.0.40
codegen_flags: <defaults>
</compile_context>

<pallas_src>
import jax
import jax.numpy as jnp
from jax.experimental import pallas as pl
from jax.experimental.pallas import tpu as pltpu


# ----------------------------------------------------------------------------
# tiling helpers (always produce blocks that exactly divide the array -> no ragged edges)
# ----------------------------------------------------------------------------
def _bh_block(bh, target=8):
    """Largest divisor of bh that is <= target (amortizes per-grid-step overhead)."""
    for cand in range(min(bh, target), 0, -1):
        if bh % cand == 0:
            return cand
    return 1


def _seq_tile(total, target=512):
    """Largest divisor of `total` that is <= target and a multiple of 8 (else full extent)."""
    if total <= target:
        return total
    t = (target // 8) * 8
    while t >= 8:
        if total % t == 0:
            return t
        t -= 8
    return total


# ----------------------------------------------------------------------------
# Pallas kernel 1: E[bh, i, m*nb+j] = exp(x_i . xs_{m,j} - |x_i|^2/2 - |xs_{m,j}|^2/2)
#   (sign-weighted reduction over `acc` is done by a tiny einsum in the wrapper)
# ----------------------------------------------------------------------------
def _exp_kernel(x_ref, xs_ref, d2_ref, e_ref):
    # x_ref:(bh, ts, p) bf16   xs_ref:(bh, M, p) bf16   d2_ref:(bh, 1, M) f32   e_ref:(bh, ts, M) f32
    x = x_ref[...]
    prod = jnp.einsum('bnp,bmp->bnm', x, xs_ref[...],
                      preferred_element_type=jnp.float32)            # MXU, M = acc*nb lanes
    xf = x.astype(jnp.float32)
    d1 = 0.5 * jnp.sum(xf * xf, axis=-1, keepdims=True)              # (bh, ts, 1)
    e_ref[...] = jnp.exp(prod - d1 - d2_ref[...]).astype(e_ref.dtype)  # EUP exp, f32


def compute_E(X_bf, XS_bf, d2):
    # X_bf:(BH, 2n, p) bf16   XS_bf:(BH, M, p) bf16   d2:(BH, 1, M) f32
    BH, two_n, p = X_bf.shape
    M = XS_bf.shape[1]
    bh_blk = _bh_block(BH)
    ts = _seq_tile(two_n)
    grid = (BH // bh_blk, two_n // ts)
    return pl.pallas_call(
        _exp_kernel,
        out_shape=jax.ShapeDtypeStruct((BH, two_n, M), jnp.float32),
        grid=grid,
        in_specs=[
            pl.BlockSpec((bh_blk, ts, p), lambda ib, it: (ib, it, 0)),
            pl.BlockSpec((bh_blk, M, p), lambda ib, it: (ib, 0, 0)),
            pl.BlockSpec((bh_blk, 1, M), lambda ib, it: (ib, 0, 0)),
        ],
        out_specs=pl.BlockSpec((bh_blk, ts, M), lambda ib, it: (ib, it, 0)),
        compiler_params=pltpu.CompilerParams(
            dimension_semantics=("parallel", "parallel")),
    )(X_bf, XS_bf, d2)


# ----------------------------------------------------------------------------
# Pallas kernel 2a: context reduction  ctx_raw = K~^T @ v   (accumulated over n-tiles)
# ----------------------------------------------------------------------------
def _ctx_kernel(k_ref, v_ref, ctx_ref):
    # k_ref:(bh, tn, nb) bf16   v_ref:(bh, tn, d) bf16   ctx_ref:(bh, nb, d) f32
    @pl.when(pl.program_id(1) == 0)
    def _():
        ctx_ref[...] = jnp.zeros_like(ctx_ref)

    ctx_ref[...] += jnp.einsum('bne,bnd->bed', k_ref[...], v_ref[...],
                               preferred_element_type=jnp.float32)    # (bh, nb, d)


def compute_ctx(K_bf, V_bf):
    BH, n, nb = K_bf.shape
    d = V_bf.shape[-1]
    bh_blk = _bh_block(BH)
    tn = _seq_tile(n)
    grid = (BH // bh_blk, n // tn)     # reduction axis last
    return pl.pallas_call(
        _ctx_kernel,
        out_shape=jax.ShapeDtypeStruct((BH, nb, d), jnp.float32),
        grid=grid,
        in_specs=[
            pl.BlockSpec((bh_blk, tn, nb), lambda ib, it: (ib, it, 0)),
            pl.BlockSpec((bh_blk, tn, d), lambda ib, it: (ib, it, 0)),
        ],
        out_specs=pl.BlockSpec((bh_blk, nb, d), lambda ib, it: (ib, 0, 0)),
        compiler_params=pltpu.CompilerParams(
            dimension_semantics=("parallel", "arbitrary")),
    )(K_bf, V_bf)


# ----------------------------------------------------------------------------
# Pallas kernel 2b: projection  out = Q @ ctx
# ----------------------------------------------------------------------------
def _proj_kernel(q_ref, ctx_ref, o_ref):
    # q_ref:(bh, tn, nb) bf16   ctx_ref:(bh, nb, d) bf16   o_ref:(bh, tn, d) f32
    o_ref[...] = jnp.einsum('bne,bed->bnd', q_ref[...], ctx_ref[...],
                            preferred_element_type=jnp.float32).astype(o_ref.dtype)


def compute_proj(Q_bf, ctx_bf):
    BH, n, nb = Q_bf.shape
    d = ctx_bf.shape[-1]
    bh_blk = _bh_block(BH)
    tn = _seq_tile(n)
    grid = (BH // bh_blk, n // tn)
    return pl.pallas_call(
        _proj_kernel,
        out_shape=jax.ShapeDtypeStruct((BH, n, d), jnp.float32),
        grid=grid,
        in_specs=[
            pl.BlockSpec((bh_blk, tn, nb), lambda ib, it: (ib, it, 0)),
            pl.BlockSpec((bh_blk, nb, d), lambda ib, it: (ib, 0, 0)),
        ],
        out_specs=pl.BlockSpec((bh_blk, tn, d), lambda ib, it: (ib, it, 0)),
        compiler_params=pltpu.CompilerParams(
            dimension_semantics=("parallel", "parallel")),
    )(Q_bf, ctx_bf)


# ----------------------------------------------------------------------------
# Plain-JAX glue (small nb x nb matrices / data-dependent gathers)
# ----------------------------------------------------------------------------
def iterative_inv(mat, n_iter=6):
    # Newton-Schulz pseudoinverse on tiny (nb, nb) matrices; matches the PyTorch 'original' init.
    # TODO(synk): tiny nb x nb Newton-Schulz inverse stays in plain JAX (no benefit from Pallas).
    I = jnp.eye(mat.shape[-1], dtype=mat.dtype)
    K = mat
    V = (1.0 / jnp.max(jnp.sum(K, axis=-2))) * jnp.swapaxes(K, -1, -2)
    for _ in range(n_iter):
        KV = jnp.matmul(K, V)
        V = jnp.matmul(0.25 * V, 13.0 * I - jnp.matmul(KV, 15.0 * I - jnp.matmul(KV, 7.0 * I - KV)))
    return V


def uniform_sketching(n, nb_rows, nb_columns, non_padding_num, key):
    # Deterministic stand-in for torch.rand-based sampling in the module's uniform_sketching.
    total = nb_rows * nb_columns
    s_rand = jax.random.uniform(key, (total,), dtype=jnp.float32)
    S = jnp.floor(non_padding_num[:, None] * s_rand[None, :]).astype(jnp.int32)   # (b, total)
    S = S.at[:, total // 2:].add(n)
    S = S.reshape(-1, nb_rows, nb_columns)                                        # (b, acc, nb)
    random_sign = jnp.ones(S.shape, dtype=jnp.float32)
    return S, random_sign


def skyformer_forward(q, k, v, mask, *, accumulation, nb_features, sketch_key):
    b, h, n, d = q.shape
    nb = nb_features
    acc = accumulation
    M = acc * nb
    data_normalizer = 32.0 ** (-0.25)   # reference hardcodes 32 (not head_dim)

    mask_b = mask[:, None, :, None]
    qs = q * (mask_b * data_normalizer)
    ks = k * (mask_b * data_normalizer)
    vs = v * mask_b
    non_padding_num = mask.sum(-1)                                                # (b,)

    S, random_sign = uniform_sketching(n, acc, nb, non_padding_num, sketch_key)

    # X = [q; k] along seq, gather the sketched rows.
    # TODO(synk): data-dependent sketch row gather stays in plain JAX (beyond index_map).
    X = jnp.concatenate([qs, ks], axis=2)                                         # (b, h, 2n, d)
    X_t = jnp.transpose(X, (0, 2, 1, 3))                                          # (b, 2n, h, d)
    XS = X_t[jnp.arange(b)[:, None, None], S]                                     # (b, acc, nb, h, d)
    XS = jnp.transpose(XS, (0, 3, 1, 2, 4))                                       # (b, h, acc, nb, d)

    BH = b * h
    X_flat = X.reshape(BH, 2 * n, d)
    XS_flat = XS.reshape(BH, M, d)
    X_bf = X_flat.astype(jnp.bfloat16)                                            # bf16 MXU operands
    XS_bf = XS_flat.astype(jnp.bfloat16)
    d2 = 0.5 * jnp.sum(XS_flat * XS_flat, axis=-1)[:, None, :]                    # (BH, 1, M) f32

    E = compute_E(X_bf, XS_bf, d2)                                                # (BH, 2n, acc*nb) f32
    E = E.reshape(b, h, 2 * n, acc, nb)
    # TODO(synk): sign-weighted reduction over `acc` (random_sign == 1) kept as a wrapper einsum.
    AS = jnp.einsum('bhnme,bme->bhne', E, random_sign)                            # (b, h, 2n, nb)

    Qm = AS[:, :, :n]                                                             # (b, h, n, nb)
    Km = AS[:, :, n:]                                                             # (b, h, n, nb)

    # STAS = S^T A S  (tiny nb x nb per head) + ridge, symmetric diag scaling, Newton-Schulz inverse.
    AS_t = jnp.transpose(AS, (0, 2, 1, 3))                                        # (b, 2n, h, nb)
    STAS_g = AS_t[jnp.arange(b)[:, None, None], S]                                # (b, acc, nb, h, nb)
    STAS = jnp.einsum('bmdhe,bmd->bhde', STAS_g, random_sign)                     # (b, h, nb, nb)
    STAS = STAS + 0.1 * jnp.eye(nb, dtype=STAS.dtype)
    D_inv = jnp.sqrt(1.0 / STAS.sum(-1))                                          # (b, h, nb)
    STAS_n = D_inv[..., :, None] * STAS * D_inv[..., None, :]
    STAS_inv = iterative_inv(STAS_n, 6)                                           # (b, h, nb, nb)

    # Fold D_inv into Sinv' and mask into K; both fuse with the bf16 casts in XLA.
    #   context = (mask*K @ Sinv')^T @ (mask*v) = Sinv'^T @ [(mask*K)^T @ (mask*v)]
    Sinv_folded = D_inv[..., :, None] * STAS_inv * D_inv[..., None, :]            # (b, h, nb, nb)
    Kmask = Km * mask[:, None, :, None]                                           # (b, h, n, nb)

    q_bf = Qm.reshape(BH, n, nb).astype(jnp.bfloat16)
    k_bf = Kmask.reshape(BH, n, nb).astype(jnp.bfloat16)
    v_bf = vs.reshape(BH, n, d).astype(jnp.bfloat16)

    ctx_raw = compute_ctx(k_bf, v_bf)                                             # (BH, nb, d) f32
    # tiny per-head nb x nb @ nb x d in f32 (applies Sinv'^T once, outside the seq-tile loop)
    ctx = jnp.einsum('bfe,bfd->bed', Sinv_folded.reshape(BH, nb, nb), ctx_raw)    # (BH, nb, d) f32

    out = compute_proj(q_bf, ctx.astype(jnp.bfloat16))                            # (BH, n, d) f32
    return out.reshape(b, h, n, d).astype(q.dtype)


if __name__ == "__main__":
    key = jax.random.PRNGKey(0)
    kq, kk, kv, ksk = jax.random.split(key, 4)

    # small shapes consistent with the module: (b, h, n, head_dim)
    b, h, n, d = 2, 2, 16, 32
    accumulation, nb_features = 2, 8

    q = jax.random.normal(kq, (b, h, n, d), dtype=jnp.float32)
    k = jax.random.normal(kk, (b, h, n, d), dtype=jnp.float32)
    v = jax.random.normal(kv, (b, h, n, d), dtype=jnp.float32)
    mask = jnp.ones((b, n), dtype=jnp.float32)
    mask = mask.at[1, 12:].set(0.0)   # some padding in the second batch element

    out = skyformer_forward(q, k, v, mask,
                            accumulation=accumulation,
                            nb_features=nb_features,
                            sketch_key=ksk)
    out = jax.block_until_ready(out)
    assert out.shape == (b, h, n, d)
    assert bool(jnp.all(jnp.isfinite(out)))
    print("KERNEL_OK")
</pallas_src>

<mosaic_0001>
module attributes {stable_mosaic.version = 11 : i64} {
  func.func @_exp_kernel(%arg0: i32, %arg1: i32, %arg2: memref<4x32x32xbf16, #tpu.memory_space<vmem>>, %arg3: memref<4x16x32xbf16, #tpu.memory_space<vmem>>, %arg4: memref<4x1x16xf32, #tpu.memory_space<vmem>>, %arg5: memref<4x32x16xf32, #tpu.memory_space<vmem>>) attributes {dimension_semantics = [#tpu.dimension_semantics<parallel>, #tpu.dimension_semantics<parallel>], iteration_bounds = array<i64: 1, 1>, scalar_prefetch = 0 : i64, scratch_operands = 0 : i64, tpu.core_type = #tpu.core_type<tc>, window_params = [{transform_indices = @transform_0, window_bounds = array<i64: 4, 32, 32>}, {transform_indices = @transform_1, window_bounds = array<i64: 4, 16, 32>}, {transform_indices = @transform_2, window_bounds = array<i64: 4, 1, 16>}, {transform_indices = @transform_3, window_bounds = array<i64: 4, 32, 16>}]} {
    %c0 = arith.constant 0 : index
    %c0_0 = arith.constant 0 : index
    %c0_1 = arith.constant 0 : index
    %0 = vector.load %arg2[%c0, %c0_0, %c0_1] : memref<4x32x32xbf16, #tpu.memory_space<vmem>>, vector<4x32x32xbf16>
    %c0_2 = arith.constant 0 : index
    %c0_3 = arith.constant 0 : index
    %c0_4 = arith.constant 0 : index
    %1 = vector.load %arg3[%c0_2, %c0_3, %c0_4] : memref<4x16x32xbf16, #tpu.memory_space<vmem>>, vector<4x16x32xbf16>
    "tpu.trace_start"() <{level = 10 : i32, message = "bnp,bmp->bnm"}> : () -> ()
    %cst = arith.constant dense<0.000000e+00> : vector<4x32x16xf32>
    %2 = tpu.matmul %0, %1, %cst {dimension_numbers = #tpu.dot_dimension_numbers<[2], [2], [1], [1], [0, 0, 0, 1, 1, 1], [0], [0]>} : vector<4x32x32xbf16>, vector<4x16x32xbf16>, vector<4x32x16xf32> -> vector<4x32x16xf32>
    "tpu.trace_stop"() : () -> ()
    %3 = arith.extf %0 : vector<4x32x32xbf16> to vector<4x32x32xf32>
    %4 = arith.mulf %3, %3 : vector<4x32x32xf32>
    %cst_5 = arith.constant dense<0.000000e+00> : vector<4x32xf32>
    %5 = vector.multi_reduction <add>, %4, %cst_5 [2] : vector<4x32x32xf32> to vector<4x32xf32>
    %6 = vector.shape_cast %5 : vector<4x32xf32> to vector<4x32x1xf32>
    %cst_6 = arith.constant 5.000000e-01 : f32
    %7 = vector.broadcast %cst_6 : f32 to vector<4x32x1xf32>
    %8 = arith.mulf %7, %6 : vector<4x32x1xf32>
    %9 = vector.broadcast %8 : vector<4x32x1xf32> to vector<4x32x16xf32>
    %10 = arith.subf %2, %9 : vector<4x32x16xf32>
    %c0_7 = arith.constant 0 : index
    %c0_8 = arith.constant 0 : index
    %c0_9 = arith.constant 0 : index
    %11 = vector.load %arg4[%c0_7, %c0_8, %c0_9] : memref<4x1x16xf32, #tpu.memory_space<vmem>>, vector<4x1x16xf32>
    %12 = vector.broadcast %11 : vector<4x1x16xf32> to vector<4x32x16xf32>
    %13 = arith.subf %10, %12 : vector<4x32x16xf32>
    %14 = math.exp %13 : vector<4x32x16xf32>
    %c0_10 = arith.constant 0 : index
    %c0_11 = arith.constant 0 : index
    %c0_12 = arith.constant 0 : index
    %15 = vector.load %arg5[%c0_10, %c0_11, %c0_12] : memref<4x32x16xf32, #tpu.memory_space<vmem>>, vector<4x32x16xf32>
    tpu.vector_store %arg5[%c0_10, %c0_11, %c0_12], %14 {strides = array<i32>} : memref<4x32x16xf32, #tpu.memory_space<vmem>>, vector<4x32x16xf32>,
    return
  }
  func.func @transform_0(%arg0: i32, %arg1: i32) -> (i32, i32, i32) {
    %c0_i32 = arith.constant 0 : i32
    %c0_i32_0 = arith.constant 0 : i32
    return %arg0, %arg1, %c0_i32 : i32, i32, i32
  }
  func.func @transform_1(%arg0: i32, %arg1: i32) -> (i32, i32, i32) {
    %c0_i32 = arith.constant 0 : i32
    %c0_i32_0 = arith.constant 0 : i32
    %c0_i32_1 = arith.constant 0 : i32
    return %arg0, %c0_i32, %c0_i32_0 : i32, i32, i32
  }
  func.func @transform_2(%arg0: i32, %arg1: i32) -> (i32, i32, i32) {
    %c0_i32 = arith.constant 0 : i32
    %c0_i32_0 = arith.constant 0 : i32
    %c0_i32_1 = arith.constant 0 : i32
    return %arg0, %c0_i32, %c0_i32_0 : i32, i32, i32
  }
  func.func @transform_3(%arg0: i32, %arg1: i32) -> (i32, i32, i32) {
    %c0_i32 = arith.constant 0 : i32
    %c0_i32_0 = arith.constant 0 : i32
    return %arg0, %arg1, %c0_i32 : i32, i32, i32
  }
}

</mosaic_0001>

<bundles_post_ra>
// kernel: tpu_custom_call.1
= control target key start
LH: loop header
LB: loop body
LE: loop exit
PB: predicated region body
PF: predicated region fallthrough
CT: control target
= control target key end

     0   :  { %8 = vsyncpa [#allocation3], 0  ;;  %s904_s0 = inlined_call_operand.hbm [shape: bf16[4,32,32], index: 0, kind: input, shape index: {}]   ;;  %s905_s1 = inlined_call_operand.hbm [shape: bf16[4,16,32], index: 1, kind: input, shape index: {}]   ;;  %s906_s2 = inlined_call_operand.vmem [shape: f32[4,1,16], index: 2, kind: input, shape index: {}]   ;;  %s907_s3 = inlined_call_operand.vmem [shape: f32[4,32,16], index: 3, kind: output, shape index: {}]  }
   0x1   :  { %9 = vsyncpa [#allocation5], 0  ;;  %s739_s12 = smov [#allocation2]   ;;  %s691_s16 = scalar_lea.hbm %s904_s0, 1024 }
   0x2   :  { %s15_s13 = sshll.u32 %s739_s12, 4  ;;  %p692_p0 = scmp.ne.s32.totalorder %s904_s0, %s691_s16  ;;  %s16_s13 = int_to_ptr.vmem [resolvable:$true] %s15_s13 }
   0x3   :  { %p695_p1 = scmp.lt.u32.totalorder %s691_s16, %s904_s0 }
   0x5   :  { %p697_p2 = pnand %p695_p1, %p692_p0 }
   0x7   :  { %700 = shalt.err (!%p697_p2)
}
   0x8   :  { %s701_s21 = scalar_lea.vmem %s16_s13, 1024  ;;  %p706_p4 = scmp.lt.s32.totalorder %s16_s13, %s16_s13 }
   0x9   :  { %p702_p3 = scmp.ne.s32.totalorder %s16_s13, %s701_s21  ;;  %p707_p5 = scmp.lt.s32.totalorder %s701_s21, %s701_s21 }
   0xb   :  { %p708_p6 = por %p707_p5, %p706_p4 }
   0xd   :  { %p709_p7 = pnand %p708_p6, %p702_p3 }
   0xf   :  { %712 = shalt.err (!%p709_p7)
}
  0x10   :  { %s740_s22 = smov 64   ;;  %s741_s23 = smov 4  }
  0x11   :  { %21 = dma.hbm_to_vmem [thread:$0]  %s904_s0, 1024, %s16_s13, [#allocation3], %s740_s22, %s740_s22, %s741_s23  }
  0x12   :  { %s742_s26 = smov [#allocation4]   ;;  %s713_s30 = scalar_lea.hbm %s905_s1, 512 }
  0x13   :  { %s27_s27 = sshll.u32 %s742_s26, 4  ;;  %p714_p8 = scmp.ne.s32.totalorder %s905_s1, %s713_s30  ;;  %s28_s27 = int_to_ptr.vmem [resolvable:$true] %s27_s27 }
  0x14   :  { %p717_p9 = scmp.lt.u32.totalorder %s713_s30, %s905_s1 }
  0x16   :  { %p719_p10 = pnand %p717_p9, %p714_p8 }
  0x18   :  { %722 = shalt.err (!%p719_p10)
}
  0x19   :  { %s723_s8 = scalar_lea.vmem %s28_s27, 512  ;;  %p728_p12 = scmp.lt.s32.totalorder %s28_s27, %s28_s27 }
  0x1a   :  { %p724_p11 = scmp.ne.s32.totalorder %s28_s27, %s723_s8  ;;  %p729_p13 = scmp.lt.s32.totalorder %s723_s8, %s723_s8 }
  0x1c   :  { %p730_p0 = por %p729_p13, %p728_p12 }
  0x1e   :  { %p731_p1 = pnand %p730_p0, %p724_p11 }
  0x20   :  { %734 = shalt.err (!%p731_p1)
}
  0x21   :  { %33 = dma.hbm_to_vmem [thread:$0]  %s905_s1, 512, %s28_s27, [#allocation5], %s740_s22, %s740_s22, %s741_s23  }
  0x22   :  { %735 = dma.done.wait [#allocation3], 1024  }
  0x23   :  { %736 = vsyncadd [#allocation3], 4294966272 }
  0x24   :  { %737 = dma.done.wait [#allocation5], 512  }
  0x25   :  { %738 = vsyncadd [#allocation5], 4294966784  ;;  %vm82_vm0 = vcmask 261120   ;;  %v639_v0 = vld [vmem:[#allocation4] sm:$0xff]   ;;  %v640_v1 = vld [vmem:[#allocation4 + $0x8] sm:$0xff]   ;;  %vm548_vm1 = vcmask 130048  }
  0x26   :  { %631 = vmatprep.subr.msk.bf16.mxu0 %vm82_vm0, %v639_v0  ;;  %v90_v2 = vsel %vm82_vm0, %v639_v0, 0  ;;  %v43_v3 = vld [vmem:[#allocation2] sm:$0xff]   ;;  %v47_v4 = vld [vmem:[#allocation2 + $0x10] sm:$0xff]   ;;  %v45_v5 = vld [vmem:[#allocation2 + $0x8] sm:$0xff]   ;;  %632 = vmatprep.subr.msk.bf16.mxu1 %vm82_vm0, %v640_v1  ;;  %v163_v6 = vsel %vm82_vm0, %v640_v1, 0 }
  0x27   :  { %608 = vmatpush3.bf16.xpose.msra.mxu0 %v90_v2  ;;  %v49_v7 = vld [vmem:[#allocation2 + $0x18] sm:$0xff]   ;;  %614 = vmatpush3.bf16.xpose.msra.mxu1 %v163_v6  ;;  %v645_v8 = vld [vmem:[#allocation4 + $0x10] sm:$0xff]   ;;  %v360_v9 = vunpack.c.l.bf16 %v43_v3  ;;  %v362_v10 = vunpack.c.l.bf16 %v45_v5  ;;  %v361_v11 = vunpack.c.h.bf16 %v43_v3  ;;  %v51_v13 = vld [vmem:[#allocation2 + $0x20] sm:$0xff]   ;;  %v363_v14 = vunpack.c.h.bf16 %v45_v5 }
  0x28   :  { %609 = vmatprep.mubr.msk.bf16.mxu0 %vm82_vm0, %v43_v3  ;;  %615 = vmatprep.mubr.msk.bf16.mxu1 %vm82_vm0, %v47_v4  ;;  %v646_v12 = vld [vmem:[#allocation4 + $0x18] sm:$0xff]   ;;  %v55_v15 = vld [vmem:[#allocation2 + $0x30] sm:$0xff]   ;;  %v364_v17 = vunpack.c.l.bf16 %v47_v4  ;;  %v236_v18 = vsel %vm82_vm0, %v645_v8, 0  ;;  %v365_v20 = vunpack.c.h.bf16 %v47_v4  ;;  %v366_v28 = vunpack.c.l.bf16 %v49_v7  ;;  %v53_v29 = vld [vmem:[#allocation2 + $0x28] sm:$0xff]  }
  0x29   :  { %633 = vmatprep.subr.msk.bf16.mxu0 %vm82_vm0, %v645_v8  ;;  %v376_v16 = vmul.f32 %v360_v9, %v360_v9  ;;  %634 = vmatprep.subr.msk.bf16.mxu1 %vm82_vm0, %v646_v12  ;;  %v378_v19 = vmul.f32 %v362_v10, %v362_v10  ;;  %v377_v22 = vmul.f32 %v361_v11, %v361_v11  ;;  %v309_v24 = vsel %vm82_vm0, %v646_v12, 0  ;;  %v57_v33 = vld [vmem:[#allocation2 + $0x38] sm:$0xff]  }
  0x2a   :  { %v379_v23 = vmul.f32 %v363_v14, %v363_v14  ;;  %v380_v27 = vmul.f32 %v364_v17, %v364_v17  ;;  %v381_v31 = vmul.f32 %v365_v20, %v365_v20  ;;  %v367_v32 = vunpack.c.h.bf16 %v49_v7  ;;  %v591_v17 = vld [vmem:[%s906_s2] ss:$0 sm:$0xff] }
  0x2b   :  { %v392_v21 = vsel %vm82_vm0, %v376_v16, 0.0  ;;  %v398_v25 = vsel %vm82_vm0, %v378_v19, 0.0  ;;  %v395_v26 = vsel %vm82_vm0, %v377_v22, 0.0  ;;  %v382_v35 = vmul.f32 %v366_v28, %v366_v28  ;;  %v592_v16 = vld [vmem:[%s906_s2 + $0x1] ss:$0 sm:$0xff] }
  0x2c   :  { %393 = vadd.xlane.f32.xlu0 %v392_v21  ;;  %399 = vadd.xlane.f32.xlu1 %v398_v25  ;;  %v401_v30 = vsel %vm82_vm0, %v379_v23, 0.0  ;;  %v404_v34 = vsel %vm82_vm0, %v380_v27, 0.0  ;;  %v368_v36 = vunpack.c.l.bf16 %v51_v13  ;;  %v407_v37 = vsel %vm82_vm0, %v381_v31, 0.0 }
  0x2d   :  { %v383_v38 = vmul.f32 %v367_v32, %v367_v32  ;;  %v369_v39 = vunpack.c.h.bf16 %v51_v13  ;;  %v410_v40 = vsel %vm82_vm0, %v382_v35, 0.0  ;;  %v370_v42 = vunpack.c.l.bf16 %v53_v29 }
  0x2e   :  { %610 = vmatmul.mubr.msk.bf16.vlgmr.msra.gmra.mrb[0].mxu0 %vm82_vm0, %v45_v5  ;;  %616 = vmatmul.mubr.msk.bf16.vlgmr.msra.gmra.mrb[0].mxu1 %vm82_vm0, %v49_v7  ;;  %v384_v41 = vmul.f32 %v368_v36, %v368_v36  ;;  %v371_v45 = vunpack.c.h.bf16 %v53_v29  ;;  %v372_v48 = vunpack.c.l.bf16 %v55_v15  ;;  %v373_v51 = vunpack.c.h.bf16 %v55_v15 }
  0x2f   :  { %620 = vmatpush3.bf16.xpose.msra.mxu0 %v236_v18  ;;  %626 = vmatpush3.bf16.xpose.msra.mxu1 %v309_v24  ;;  %v413_v43 = vsel %vm82_vm0, %v383_v38, 0.0  ;;  %v385_v44 = vmul.f32 %v369_v39, %v369_v39  ;;  %v386_v47 = vmul.f32 %v370_v42, %v370_v42  ;;  %v374_v54 = vunpack.c.l.bf16 %v57_v33 }
  0x30   :  { %621 = vmatprep.mubr.msk.bf16.mxu0 %vm82_vm0, %v51_v13  ;;  %627 = vmatprep.mubr.msk.bf16.mxu1 %vm82_vm0, %v55_v15  ;;  %v416_v46 = vsel %vm82_vm0, %v384_v41, 0.0  ;;  %v387_v50 = vmul.f32 %v371_v45, %v371_v45  ;;  %v388_v53 = vmul.f32 %v372_v48, %v372_v48  ;;  %v389_v56 = vmul.f32 %v373_v51, %v373_v51 }
  0x31   :  { %396 = vadd.xlane.f32.xlu0 %v395_v26  ;;  %402 = vadd.xlane.f32.xlu1 %v401_v30  ;;  %v419_v49 = vsel %vm82_vm0, %v385_v44, 0.0  ;;  %v422_v52 = vsel %vm82_vm0, %v386_v47, 0.0  ;;  %v375_v57 = vunpack.c.h.bf16 %v57_v33  ;;  %v390_v59 = vmul.f32 %v374_v54, %v374_v54 }
  0x32   :  { %v425_v55 = vsel %vm82_vm0, %v387_v50, 0.0  ;;  %v428_v58 = vsel %vm82_vm0, %v388_v53, 0.0  ;;  %v431_v60 = vsel %vm82_vm0, %v389_v56, 0.0 }
  0x33   :  { %v391_v61 = vmul.f32 %v375_v57, %v375_v57  ;;  %v434_v62 = vsel %vm82_vm0, %v390_v59, 0.0 }
  0x35   :  { %405 = vadd.xlane.f32.xlu0 %v404_v34  ;;  %408 = vadd.xlane.f32.xlu1 %v407_v37  ;;  %v437_v63 = vsel %vm82_vm0, %v391_v61, 0.0  ;;  %v593_v61 = vld [vmem:[%s906_s2 + $0x2] ss:$0 sm:$0xff] }
  0x36   :  { %622 = vmatmul.mubr.msk.bf16.vlgmr.msra.gmra.mrb[4].mxu0 %vm82_vm0, %v53_v29  ;;  %628 = vmatmul.mubr.msk.bf16.vlgmr.msra.gmra.mrb[4].mxu1 %vm82_vm0, %v57_v33 }
  0x39   :  { %411 = vadd.xlane.f32.xlu0 %v410_v40  ;;  %414 = vadd.xlane.f32.xlu1 %v413_v43 }
  0x3d   :  { %417 = vadd.xlane.f32.xlu0 %v416_v46  ;;  %420 = vadd.xlane.f32.xlu1 %v419_v49 }
  0x41   :  { %423 = vadd.xlane.f32.xlu0 %v422_v52  ;;  %426 = vadd.xlane.f32.xlu1 %v425_v55 }
  0x45   :  { %429 = vadd.xlane.f32.xlu0 %v428_v58  ;;  %432 = vadd.xlane.f32.xlu1 %v431_v60  ;;  %v594_v60 = vld [vmem:[%s906_s2 + $0x3] ss:$0 sm:$0xff] }
  0x49   :  { %435 = vadd.xlane.f32.xlu0 %v434_v62  ;;  %438 = vadd.xlane.f32.xlu1 %v437_v63 }
  0xb9   :  { %v394_v0 = vpop.xlane.xlu0 %393  ;;  %v400_v1 = vpop.xlane.xlu1 %399 }
  0xba   :  { %v440_v13 = vmul.f32 0.5, %v394_v0  ;;  %v442_v14 = vmul.f32 0.5, %v400_v1 }
  0xbe   :  { %v397_v2 = vpop.xlane.xlu0 %396  ;;  %v403_v3 = vpop.xlane.xlu1 %402 }
  0xbf   :  { %v441_v15 = vmul.f32 0.5, %v397_v2  ;;  %v443_v19 = vmul.f32 0.5, %v403_v3 }
  0xc2   :  { %v406_v4 = vpop.xlane.xlu0 %405  ;;  %v409_v5 = vpop.xlane.xlu1 %408 }
  0xc3   :  { %v444_v20 = vmul.f32 0.5, %v406_v4  ;;  %v445_v21 = vmul.f32 0.5, %v409_v5 }
  0xc6   :  { %v412_v6 = vpop.xlane.xlu0 %411  ;;  %v415_v7 = vpop.xlane.xlu1 %414 }
  0xc7   :  { %v446_v22 = vmul.f32 0.5, %v412_v6  ;;  %v447_v25 = vmul.f32 0.5, %v415_v7 }
  0xca   :  { %v418_v8 = vpop.xlane.xlu0 %417  ;;  %v421_v9 = vpop.xlane.xlu1 %420 }
  0xcb   :  { %v825_v26 = vmul.f32 0.5, %v418_v8  ;;  %v827_v27 = vmul.f32 0.5, %v421_v9 }
  0xce   :  { %v424_v10 = vpop.xlane.xlu0 %423  ;;  %v427_v11 = vpop.xlane.xlu1 %426 }
  0xcf   :  { %v450_v31 = vmul.f32 0.5, %v424_v10  ;;  %v829_v33 = vmul.f32 0.5, %v427_v11 }
  0xd2   :  { %v430_v12 = vpop.xlane.xlu0 %429  ;;  %v433_v18 = vpop.xlane.xlu1 %432 }
  0xd3   :  { %v452_v63 = vmul.f32 0.5, %v430_v12  ;;  %v453_v3 = vmul.f32 0.5, %v433_v18 }
  0xd6   :  { %v436_v24 = vpop.xlane.xlu0 %435  ;;  %v439_v52 = vpop.xlane.xlu1 %438 }
  0xd7   :  { %v454_v42 = vmul.f32 0.5, %v436_v24  ;;  %v455_v0 = vmul.f32 0.5, %v439_v52 }
 0x101   :  { %v611_v23 = vpop.f32.mrb[0].mxu0  ;;  %v617_v28 = vpop.f32.mrb[0].mxu1 }
 0x102   :  { %v458_v29 = vsub.f32 %v611_v23, %v442_v14  ;;  %v126_v30 = vpop.f32.mrb[1].mxu0  ;;  %v462_v32 = vsub.f32 %v617_v28, %v446_v22  ;;  %v199_v35 = vpop.f32.mrb[1].mxu1 }
 0x103   :  { %v456_v34 = vsub.f32 %v126_v30, %v440_v13  ;;  %v612_v36 = vpop.f32.mrb[2].mxu0  ;;  %v460_v38 = vsub.f32 %v199_v35, %v444_v20  ;;  %v618_v40 = vpop.f32.mrb[2].mxu1 }
 0x104   :  { %v502_v37 = vsub.f32 %v458_v29, %v591_v17  ;;  %v459_v39 = vsub.f32 %v612_v36, %v443_v19  ;;  %v129_v41 = vpop.f32.mrb[3].mxu0  ;;  %v506_v43 = vsub.f32 %v462_v32, %v592_v16  ;;  %v463_v45 = vsub.f32 %v618_v40, %v447_v25  ;;  %v202_v46 = vpop.f32.mrb[3].mxu1 }
 0x105   :  { %v500_v44 = vsub.f32 %v456_v34, %v591_v17  ;;  %v457_v47 = vsub.f32 %v129_v41, %v441_v15  ;;  %v504_v49 = vsub.f32 %v460_v38, %v592_v16  ;;  %v461_v51 = vsub.f32 %v202_v46, %v445_v21 }
 0x106   :  { %v520_v48 = vmul.f32 1.442695, %v502_v37  ;;  %v503_v50 = vsub.f32 %v459_v39, %v591_v17  ;;  %v528_v53 = vmul.f32 1.442695, %v506_v43  ;;  %v507_v55 = vsub.f32 %v463_v45, %v592_v16 }
 0x107   :  { %v516_v54 = vmul.f32 1.442695, %v500_v44  ;;  %v501_v56 = vsub.f32 %v457_v47, %v591_v17  ;;  %v524_v57 = vmul.f32 1.442695, %v504_v49  ;;  %v505_v59 = vsub.f32 %v461_v51, %v592_v16 }
 0x108   :  { %659 = vpow2.f32 %v520_v48  ;;  %v522_v58 = vmul.f32 1.442695, %v503_v50  ;;  %v530_v62 = vmul.f32 1.442695, %v507_v55 }
 0x109   :  { %661 = vpow2.f32 %v528_v53  ;;  %v623_v1 = vpop.f32.mrb[4].mxu0  ;;  %v526_v2 = vmul.f32 1.442695, %v505_v59  ;;  %v629_v4 = vpop.f32.mrb[4].mxu1  ;;  %v518_v7 = vmul.f32 1.442695, %v501_v56 }
 0x10a   :  { %663 = vpow2.f32 %v516_v54  ;;  %v466_v5 = vsub.f32 %v623_v1, %v450_v31  ;;  %v272_v6 = vpop.f32.mrb[5].mxu0  ;;  %v470_v8 = vsub.f32 %v629_v4, %v454_v42  ;;  %v345_v10 = vpop.f32.mrb[5].mxu1 }
 0x10b   :  { %665 = vpow2.f32 %v524_v57  ;;  %v464_v9 = vsub.f32 %v272_v6, %v825_v26  ;;  %v624_v11 = vpop.f32.mrb[6].mxu0  ;;  %v468_v14 = vsub.f32 %v345_v10, %v452_v63  ;;  %v630_v15 = vpop.f32.mrb[6].mxu1 }
 0x10c   :  { %667 = vpow2.f32 %v522_v58  ;;  %v510_v13 = vsub.f32 %v466_v5, %v593_v61  ;;  %v467_v12 = vsub.f32 %v624_v11, %v829_v33  ;;  %v275_v16 = vpop.f32.mrb[7].mxu0  ;;  %v514_v17 = vsub.f32 %v470_v8, %v594_v60  ;;  %v348_v20 = vpop.f32.mrb[7].mxu1 }
 0x10d   :  { %669 = vpow2.f32 %v530_v62  ;;  %v508_v18 = vsub.f32 %v464_v9, %v593_v61  ;;  %v471_v19 = vsub.f32 %v630_v15, %v455_v0  ;;  %v512_v22 = vsub.f32 %v468_v14, %v594_v60 }
 0x10e   :  { %671 = vpow2.f32 %v526_v2  ;;  %v536_v21 = vmul.f32 1.442695, %v510_v13  ;;  %v511_v23 = vsub.f32 %v467_v12, %v593_v61  ;;  %v544_v24 = vmul.f32 1.442695, %v514_v17 }
 0x10f   :  { %673 = vpow2.f32 %v518_v7  ;;  %v532_v25 = vmul.f32 1.442695, %v508_v18  ;;  %v515_v26 = vsub.f32 %v471_v19, %v594_v60  ;;  %v540_v28 = vmul.f32 1.442695, %v512_v22 }
 0x110   :  { %675 = vpow2.f32 %v536_v21  ;;  %v538_v29 = vmul.f32 1.442695, %v511_v23  ;;  %v465_v30 = vsub.f32 %v275_v16, %v827_v27  ;;  %v469_v32 = vsub.f32 %v348_v20, %v453_v3 }
 0x111   :  { %677 = vpow2.f32 %v544_v24  ;;  %v546_v31 = vmul.f32 1.442695, %v515_v26 }
 0x112   :  { %v660_v33 = vpop.eup %659  ;;  %679 = vpow2.f32 %v532_v25  ;;  %v509_v34 = vsub.f32 %v465_v30, %v593_v61  ;;  %v513_v36 = vsub.f32 %v469_v32, %v594_v60 }
 0x113   :  { %v662_v35 = vpop.eup %661  ;;  %551 = vst.msk [vmem:[%s907_s3 + $0x10] sm:$0xff] %vm548_vm1, %v660_v33  ;;  %681 = vpow2.f32 %v540_v28 }
 0x114   :  { %v664_v37 = vpop.eup %663  ;;  %555 = vst.msk [vmem:[%s907_s3 + $0x30] sm:$0xff] %vm548_vm1, %v662_v35  ;;  %683 = vpow2.f32 %v538_v29  ;;  %v534_v27 = vmul.f32 1.442695, %v509_v34  ;;  %v542_v39 = vmul.f32 1.442695, %v513_v36 }
 0x115   :  { %v666_v38 = vpop.eup %665  ;;  %549 = vst.msk [vmem:[%s907_s3] sm:$0xff] %vm548_vm1, %v664_v37  ;;  %685 = vpow2.f32 %v546_v31 }
 0x116   :  { %v668_v40 = vpop.eup %667  ;;  %553 = vst.msk [vmem:[%s907_s3 + $0x20] sm:$0xff] %vm548_vm1, %v666_v38  ;;  %687 = vpow2.f32 %v534_v27 }
 0x117   :  { %v670_v41 = vpop.eup %669  ;;  %552 = vst.msk [vmem:[%s907_s3 + $0x18] sm:$0xff] %vm548_vm1, %v668_v40  ;;  %689 = vpow2.f32 %v542_v39 }
 0x118   :  { %v672_v42 = vpop.eup %671  ;;  %556 = vst.msk [vmem:[%s907_s3 + $0x38] sm:$0xff] %vm548_vm1, %v670_v41 }
 0x119   :  { %v674_v43 = vpop.eup %673  ;;  %554 = vst.msk [vmem:[%s907_s3 + $0x28] sm:$0xff] %vm548_vm1, %v672_v42 }
 0x11a   :  { %v676_v44 = vpop.eup %675  ;;  %550 = vst.msk [vmem:[%s907_s3 + $0x8] sm:$0xff] %vm548_vm1, %v674_v43 }
 0x11b   :  { %v678_v45 = vpop.eup %677  ;;  %559 = vst.msk [vmem:[%s907_s3 + $0x50] sm:$0xff] %vm548_vm1, %v676_v44 }
 0x11c   :  { %v680_v46 = vpop.eup %679  ;;  %563 = vst.msk [vmem:[%s907_s3 + $0x70] sm:$0xff] %vm548_vm1, %v678_v45 }
 0x11d   :  { %v682_v47 = vpop.eup %681  ;;  %557 = vst.msk [vmem:[%s907_s3 + $0x40] sm:$0xff] %vm548_vm1, %v680_v46 }
 0x11e   :  { %v684_v48 = vpop.eup %683  ;;  %561 = vst.msk [vmem:[%s907_s3 + $0x60] sm:$0xff] %vm548_vm1, %v682_v47 }
 0x11f   :  { %v686_v49 = vpop.eup %685  ;;  %560 = vst.msk [vmem:[%s907_s3 + $0x58] sm:$0xff] %vm548_vm1, %v684_v48 }
 0x120   :  { %v688_v50 = vpop.eup %687  ;;  %564 = vst.msk [vmem:[%s907_s3 + $0x78] sm:$0xff] %vm548_vm1, %v686_v49 }
 0x121   :  { %v690_v51 = vpop.eup %689  ;;  %558 = vst.msk [vmem:[%s907_s3 + $0x48] sm:$0xff] %vm548_vm1, %v688_v50 }
 0x122   :  { %562 = vst.msk [vmem:[%s907_s3 + $0x68] sm:$0xff] %vm548_vm1, %v690_v51 }
 0x123   :  { %569 = vsyncpa [#allocation3], 1 }
 0x124   :  { %570 = vsyncpa [#allocation5], 1 }

</bundles_post_ra>
